<compile_context>
chip_gen: v7x
topology: tpu7x:2x2x1
jax: 0.10.0
libtpu: 0.0.40
codegen_flags: <defaults>
</compile_context>

<pallas_src>
import numpy as np
import jax
import jax.numpy as jnp
from jax import lax
from jax.experimental import pallas as pl
from jax.experimental.pallas import tpu as pltpu

IN_C, OUT_C, K, STRIDE, PAD = 4, 4, 4, 2, 1      # DeconvBlock config
PATCH = 3                                        # 3x3 union window over the (pad-1) input
NPHASE = STRIDE * STRIDE                         # 4 output phases (2x2 pixel shuffle)
NTAPS = PATCH * PATCH                            # 9 taps
LANE = 128

# phase -> {window-row dh -> kernel-row kh}; rows absent from the dict are zero taps.
# Derivation: oh = 2*ih - PAD + kh, oh = 2*oh' + ph, dh = ih - oh' + 1 (input padded by 1).
_KMAP = {0: {0: 3, 1: 1}, 1: {1: 2, 2: 0}}


def _round_up(v, m):
    return (v + m - 1) // m * m


def prepare_weights(w_pt, b):
    """(Cin,Cout,K,K) ConvTranspose2d weight + bias -> (4*Cout, 9*Cin+1) bf16 matmul weight.

    Column (dh*3+dw)*Cin + ci = tap weight for window offset (dh,dw), input channel ci;
    last column = bias (matched against the ones row of the in-kernel slab).
    Row (ph*2+pw)*Cout + co = output phase (ph,pw), output channel co.
    """
    w_np = np.asarray(w_pt, np.float32)
    Cin, Cout, _, _ = w_np.shape
    Wmat = np.zeros((NPHASE * Cout, NTAPS * Cin + 1), np.float32)
    for ph in range(STRIDE):
        for pw in range(STRIDE):
            r0 = (ph * STRIDE + pw) * Cout
            for dh, kh in _KMAP[ph].items():
                for dw, kw in _KMAP[pw].items():
                    c0 = (dh * PATCH + dw) * Cin
                    # Wmat[r0 + co, c0 + ci] = w[ci, co, kh, kw]
                    Wmat[r0:r0 + Cout, c0:c0 + Cin] = w_np[:, :, kh, kw].T
    Wmat[:, -1] = np.tile(np.asarray(b, np.float32), NPHASE)      # folded bias column
    return jnp.asarray(Wmat, jnp.bfloat16)


def _make_kernel(cin, wp, lpad):
    nrows = NTAPS * cin

    def kernel(w_ref, x_ref, o_ref, slab_ref):
        # w_ref   : (4*Cout, 9*Cin+1) bf16   phase-expanded weight + bias column
        # x_ref   : (Cin, Lflat)      bf16   flat zero-padded image of this batch element
        # o_ref   : (4*Cout, Lpad)    f32    phased, lane-dense output
        # slab_ref: (9*Cin+1, Lpad)   bf16   VMEM scratch (im2col slab + ones row)
        #
        # In-kernel im2col: each tap row-block is a static shifted lane slice of the flat
        # padded image -- no gather, no HBM-side patch materialization.
        for t in range(NTAPS):
            dh, dw = divmod(t, PATCH)
            off = dh * wp + dw
            slab_ref[t * cin:(t + 1) * cin, :] = x_ref[:, off:off + lpad]
        slab_ref[nrows:nrows + 1, :] = jnp.ones((1, lpad), jnp.bfloat16)   # bias row
        acc = jnp.dot(w_ref[...], slab_ref[...],
                      preferred_element_type=jnp.float32)    # one MXU matmul, f32 acc
        o_ref[...] = jnp.maximum(acc, 0.0)                   # ReLU; Norm(None) == identity
    return kernel


@jax.jit
def deconv_block_phased(x_nchw, Wmat):
    """Fused deconv kernel; returns the phased layout (N, 4*Cout, Lpad).

    Column m = i*(W+2) + j holds output superpixel (i, j); columns with j >= W (and the
    pad-to-128 tail) are garbage.  Production consumers should read this layout directly
    instead of paying an extra NCHW pixel-shuffle round trip through HBM.
    """
    N, Cin, H, W = x_nchw.shape
    Hp, Wp = H + 2, W + 2
    R, KDIM = Wmat.shape
    assert KDIM == NTAPS * Cin + 1 and R == NPHASE * OUT_C

    Lval = H * Wp                                   # columns carrying real superpixels
    Lpad = _round_up(Lval, LANE)                    # lane-dense (multiple of 128) columns
    offmax = (PATCH - 1) * Wp + (PATCH - 1)         # largest tap lane offset (= 2*Wp+2)
    Lflat = _round_up(Lpad + offmax, LANE)          # flat padded-image length per (n, c)

    # Flat zero-padded image per (n, c), cast to bf16.  Only the conv's own halo
    # (~(Hp*Wp)/(H*W)) of amplification; valid output columns never read past their own
    # image's real data (max read index = (H+1)*Wp + (W+1) = Hp*Wp - 1), so the zero tail
    # only feeds garbage columns that are dropped afterwards.
    xp = jnp.pad(x_nchw, ((0, 0), (0, 0), (1, 1), (1, 1))).astype(jnp.bfloat16)
    xflat = xp.reshape(N, Cin, Hp * Wp)
    X = jnp.pad(xflat, ((0, 0), (0, 0), (0, Lflat - Hp * Wp)))

    kernel = _make_kernel(Cin, Wp, Lpad)
    return pl.pallas_call(
        kernel,
        out_shape=jax.ShapeDtypeStruct((N, R, Lpad), jnp.float32),
        grid=(N,),                                   # one image per step; v7x: 2 TCs
        in_specs=[
            pl.BlockSpec((R, KDIM), lambda n: (0, 0)),            # weights stay resident
            pl.BlockSpec((None, Cin, Lflat), lambda n: (n, 0, 0)),
        ],
        out_specs=pl.BlockSpec((None, R, Lpad), lambda n: (n, 0, 0)),
        scratch_shapes=[pltpu.VMEM((KDIM, Lpad), jnp.bfloat16)],
        compiler_params=pltpu.CompilerParams(dimension_semantics=("parallel",)),
    )(Wmat, X)


@jax.jit
def deconv_block(x_nchw, Wmat):
    """Drop-in NCHW forward: relu(conv_transpose2d(x) + b); Norm(None) is the identity."""
    N, Cin, H, W = x_nchw.shape
    Wp = W + 2
    Cout = Wmat.shape[0] // NPHASE
    phased = deconv_block_phased(x_nchw, Wmat)                    # (N, 4*Cout, Lpad)
    # TODO(synk): the 2x2 pixel shuffle is a lane interleave with no cheap Mosaic lowering;
    # production consumers should use deconv_block_phased() directly (review option 1)
    # rather than pay this extra output round trip.
    op = phased[:, :, :H * Wp].reshape(N, STRIDE, STRIDE, Cout, H, Wp)[..., :W]
    return (op.transpose(0, 3, 4, 1, 5, 2)                        # (n,co,i,ph,j,pw)
              .reshape(N, Cout, H * STRIDE, W * STRIDE))


def reference(x_nchw, w_pt, b):
    """Pure-JAX reference (ConvTranspose2d == dilated conv with flipped kernel),
    evaluated on the same bf16-rounded operands the kernel consumes."""
    xr = x_nchw.astype(jnp.bfloat16).astype(jnp.float32)
    wr = w_pt.astype(jnp.bfloat16).astype(jnp.float32)
    br = b.astype(jnp.bfloat16).astype(jnp.float32)
    w_conv = jnp.transpose(jnp.flip(wr, axis=(2, 3)), (1, 0, 2, 3))   # (Cout,Cin,K,K)
    pe = K - 1 - PAD
    out = lax.conv_general_dilated(
        xr, w_conv, window_strides=(1, 1), padding=[(pe, pe), (pe, pe)],
        lhs_dilation=(STRIDE, STRIDE),
        dimension_numbers=("NCHW", "OIHW", "NCHW"),
        precision=lax.Precision.HIGHEST)
    return jnp.maximum(out + br.reshape(1, -1, 1, 1), 0.0)


if __name__ == "__main__":
    key = jax.random.PRNGKey(0)
    k1, k2, k3 = jax.random.split(key, 3)
    N, H, W = 2, 16, 16
    x = jax.random.normal(k1, (N, IN_C, H, W), jnp.float32)
    # ConvTranspose2d weight layout: (in_channels, out_channels, kH, kW)
    w_pt = jax.random.normal(k2, (IN_C, OUT_C, K, K), jnp.float32) * 0.1
    b = jax.random.normal(k3, (OUT_C,), jnp.float32) * 0.1

    Wmat = prepare_weights(w_pt, b)          # one-time constant prep (hoisted)
    out = deconv_block(x, Wmat)
    jax.block_until_ready(out)

    ref = reference(x, w_pt, b)
    np.testing.assert_allclose(np.asarray(out), np.asarray(ref), atol=2e-3, rtol=2e-3)

    print("KERNEL_OK")
</pallas_src>

<mosaic_0001>
module attributes {stable_mosaic.version = 11 : i64} {
  func.func @kernel(%arg0: i32, %arg1: memref<16x37xbf16, #tpu.memory_space<vmem>>, %arg2: memref<1x4x512xbf16, #tpu.memory_space<vmem>>, %arg3: memref<1x16x384xf32, #tpu.memory_space<vmem>>, %arg4: memref<37x384xbf16, #tpu.memory_space<vmem>>) attributes {dimension_semantics = [#tpu.dimension_semantics<parallel>], iteration_bounds = array<i64: 2>, scalar_prefetch = 0 : i64, scratch_operands = 1 : i64, tpu.core_type = #tpu.core_type<tc>, window_params = [{pipeline_mode = #tpu.pipeline_mode<synchronous>, transform_indices = @transform_0, window_bounds = array<i64: 16, 37>}, {transform_indices = @transform_1, window_bounds = array<i64: 1, 4, 512>}, {transform_indices = @transform_2, window_bounds = array<i64: 1, 16, 384>}]} {
    %c0 = arith.constant 0 : index
    %c0_0 = arith.constant 0 : index
    %c0_1 = arith.constant 0 : index
    %0 = vector.load %arg2[%c0, %c0_0, %c0_1] : memref<1x4x512xbf16, #tpu.memory_space<vmem>>, vector<1x4x384xbf16>
    %1 = vector.shape_cast %0 : vector<1x4x384xbf16> to vector<4x384xbf16>
    %c0_2 = arith.constant 0 : index
    %c0_3 = arith.constant 0 : index
    %2 = vector.load %arg4[%c0_2, %c0_3] : memref<37x384xbf16, #tpu.memory_space<vmem>>, vector<4x384xbf16>
    tpu.vector_store %arg4[%c0_2, %c0_3], %1 {strides = array<i32>} : memref<37x384xbf16, #tpu.memory_space<vmem>>, vector<4x384xbf16>,
    %c0_4 = arith.constant 0 : index
    %c0_5 = arith.constant 0 : index
    %c1 = arith.constant 1 : index
    %3 = vector.load %arg2[%c0_4, %c0_5, %c1] : memref<1x4x512xbf16, #tpu.memory_space<vmem>>, vector<1x4x384xbf16>
    %4 = vector.shape_cast %3 : vector<1x4x384xbf16> to vector<4x384xbf16>
    %c4 = arith.constant 4 : index
    %c0_6 = arith.constant 0 : index
    %5 = vector.load %arg4[%c4, %c0_6] : memref<37x384xbf16, #tpu.memory_space<vmem>>, vector<4x384xbf16>
    tpu.vector_store %arg4[%c4, %c0_6], %4 {strides = array<i32>} : memref<37x384xbf16, #tpu.memory_space<vmem>>, vector<4x384xbf16>,
    %c0_7 = arith.constant 0 : index
    %c0_8 = arith.constant 0 : index
    %c2 = arith.constant 2 : index
    %6 = vector.load %arg2[%c0_7, %c0_8, %c2] : memref<1x4x512xbf16, #tpu.memory_space<vmem>>, vector<1x4x384xbf16>
    %7 = vector.shape_cast %6 : vector<1x4x384xbf16> to vector<4x384xbf16>
    %c8 = arith.constant 8 : index
    %c0_9 = arith.constant 0 : index
    %8 = vector.load %arg4[%c8, %c0_9] : memref<37x384xbf16, #tpu.memory_space<vmem>>, vector<4x384xbf16>
    tpu.vector_store %arg4[%c8, %c0_9], %7 {strides = array<i32>} : memref<37x384xbf16, #tpu.memory_space<vmem>>, vector<4x384xbf16>,
    %c0_10 = arith.constant 0 : index
    %c0_11 = arith.constant 0 : index
    %c18 = arith.constant 18 : index
    %9 = vector.load %arg2[%c0_10, %c0_11, %c18] : memref<1x4x512xbf16, #tpu.memory_space<vmem>>, vector<1x4x384xbf16>
    %10 = vector.shape_cast %9 : vector<1x4x384xbf16> to vector<4x384xbf16>
    %c12 = arith.constant 12 : index
    %c0_12 = arith.constant 0 : index
    %11 = vector.load %arg4[%c12, %c0_12] : memref<37x384xbf16, #tpu.memory_space<vmem>>, vector<4x384xbf16>
    tpu.vector_store %arg4[%c12, %c0_12], %10 {strides = array<i32>} : memref<37x384xbf16, #tpu.memory_space<vmem>>, vector<4x384xbf16>,
    %c0_13 = arith.constant 0 : index
    %c0_14 = arith.constant 0 : index
    %c19 = arith.constant 19 : index
    %12 = vector.load %arg2[%c0_13, %c0_14, %c19] : memref<1x4x512xbf16, #tpu.memory_space<vmem>>, vector<1x4x384xbf16>
    %13 = vector.shape_cast %12 : vector<1x4x384xbf16> to vector<4x384xbf16>
    %c16 = arith.constant 16 : index
    %c0_15 = arith.constant 0 : index
    %14 = vector.load %arg4[%c16, %c0_15] : memref<37x384xbf16, #tpu.memory_space<vmem>>, vector<4x384xbf16>
    tpu.vector_store %arg4[%c16, %c0_15], %13 {strides = array<i32>} : memref<37x384xbf16, #tpu.memory_space<vmem>>, vector<4x384xbf16>,
    %c0_16 = arith.constant 0 : index
    %c0_17 = arith.constant 0 : index
    %c20 = arith.constant 20 : index
    %15 = vector.load %arg2[%c0_16, %c0_17, %c20] : memref<1x4x512xbf16, #tpu.memory_space<vmem>>, vector<1x4x384xbf16>
    %16 = vector.shape_cast %15 : vector<1x4x384xbf16> to vector<4x384xbf16>
    %c20_18 = arith.constant 20 : index
    %c0_19 = arith.constant 0 : index
    %17 = vector.load %arg4[%c20_18, %c0_19] : memref<37x384xbf16, #tpu.memory_space<vmem>>, vector<4x384xbf16>
    tpu.vector_store %arg4[%c20_18, %c0_19], %16 {strides = array<i32>} : memref<37x384xbf16, #tpu.memory_space<vmem>>, vector<4x384xbf16>,
    %c0_20 = arith.constant 0 : index
    %c0_21 = arith.constant 0 : index
    %c36 = arith.constant 36 : index
    %18 = vector.load %arg2[%c0_20, %c0_21, %c36] : memref<1x4x512xbf16, #tpu.memory_space<vmem>>, vector<1x4x384xbf16>
    %19 = vector.shape_cast %18 : vector<1x4x384xbf16> to vector<4x384xbf16>
    %c24 = arith.constant 24 : index
    %c0_22 = arith.constant 0 : index
    %20 = vector.load %arg4[%c24, %c0_22] : memref<37x384xbf16, #tpu.memory_space<vmem>>, vector<4x384xbf16>
    tpu.vector_store %arg4[%c24, %c0_22], %19 {strides = array<i32>} : memref<37x384xbf16, #tpu.memory_space<vmem>>, vector<4x384xbf16>,
    %c0_23 = arith.constant 0 : index
    %c0_24 = arith.constant 0 : index
    %c37 = arith.constant 37 : index
    %21 = vector.load %arg2[%c0_23, %c0_24, %c37] : memref<1x4x512xbf16, #tpu.memory_space<vmem>>, vector<1x4x384xbf16>
    %22 = vector.shape_cast %21 : vector<1x4x384xbf16> to vector<4x384xbf16>
    %c28 = arith.constant 28 : index
    %c0_25 = arith.constant 0 : index
    %23 = vector.load %arg4[%c28, %c0_25] : memref<37x384xbf16, #tpu.memory_space<vmem>>, vector<4x384xbf16>
    tpu.vector_store %arg4[%c28, %c0_25], %22 {strides = array<i32>} : memref<37x384xbf16, #tpu.memory_space<vmem>>, vector<4x384xbf16>,
    %c0_26 = arith.constant 0 : index
    %c0_27 = arith.constant 0 : index
    %c38 = arith.constant 38 : index
    %24 = vector.load %arg2[%c0_26, %c0_27, %c38] : memref<1x4x512xbf16, #tpu.memory_space<vmem>>, vector<1x4x384xbf16>
    %25 = vector.shape_cast %24 : vector<1x4x384xbf16> to vector<4x384xbf16>
    %c32 = arith.constant 32 : index
    %c0_28 = arith.constant 0 : index
    %26 = vector.load %arg4[%c32, %c0_28] : memref<37x384xbf16, #tpu.memory_space<vmem>>, vector<4x384xbf16>
    tpu.vector_store %arg4[%c32, %c0_28], %25 {strides = array<i32>} : memref<37x384xbf16, #tpu.memory_space<vmem>>, vector<4x384xbf16>,
    %cst = arith.constant 1.000000e+00 : bf16
    %27 = vector.broadcast %cst : bf16 to vector<1x384xbf16>
    %c36_29 = arith.constant 36 : index
    %c0_30 = arith.constant 0 : index
    %28 = vector.load %arg4[%c36_29, %c0_30] : memref<37x384xbf16, #tpu.memory_space<vmem>>, vector<1x384xbf16>
    tpu.vector_store %arg4[%c36_29, %c0_30], %27 {strides = array<i32>} : memref<37x384xbf16, #tpu.memory_space<vmem>>, vector<1x384xbf16>,
    %c0_31 = arith.constant 0 : index
    %c0_32 = arith.constant 0 : index
    %29 = vector.load %arg1[%c0_31, %c0_32] : memref<16x37xbf16, #tpu.memory_space<vmem>>, vector<16x37xbf16>
    %c0_33 = arith.constant 0 : index
    %c0_34 = arith.constant 0 : index
    %30 = vector.load %arg4[%c0_33, %c0_34] : memref<37x384xbf16, #tpu.memory_space<vmem>>, vector<37x384xbf16>
    %cst_35 = arith.constant dense<0.000000e+00> : vector<16x384xf32>
    %31 = tpu.matmul %29, %30, %cst_35 {dimension_numbers = #tpu.dot_dimension_numbers<[1], [0], [0], [1], [0, 0, 1, 1], [], []>} : vector<16x37xbf16>, vector<37x384xbf16>, vector<16x384xf32> -> vector<16x384xf32>
    %cst_36 = arith.constant 0.000000e+00 : f32
    %32 = vector.broadcast %cst_36 : f32 to vector<16x384xf32>
    %33 = arith.maximumf %31, %32 : vector<16x384xf32>
    %c0_37 = arith.constant 0 : index
    %c0_38 = arith.constant 0 : index
    %c0_39 = arith.constant 0 : index
    %34 = vector.load %arg3[%c0_37, %c0_38, %c0_39] : memref<1x16x384xf32, #tpu.memory_space<vmem>>, vector<1x16x384xf32>
    %35 = vector.shape_cast %34 : vector<1x16x384xf32> to vector<16x384xf32>
    %36 = vector.shape_cast %33 : vector<16x384xf32> to vector<1x16x384xf32>
    tpu.vector_store %arg3[%c0_37, %c0_38, %c0_39], %36 {strides = array<i32>} : memref<1x16x384xf32, #tpu.memory_space<vmem>>, vector<1x16x384xf32>,
    return
  }
  func.func @transform_0(%arg0: i32) -> (i32, i32) {
    %c0_i32 = arith.constant 0 : i32
    %c0_i32_0 = arith.constant 0 : i32
    %c0_i32_1 = arith.constant 0 : i32
    return %c0_i32, %c0_i32_0 : i32, i32
  }
  func.func @transform_1(%arg0: i32) -> (i32, i32, i32) {
    %c0_i32 = arith.constant 0 : i32
    %c0_i32_0 = arith.constant 0 : i32
    %c0_i32_1 = arith.constant 0 : i32
    return %arg0, %c0_i32, %c0_i32_0 : i32, i32, i32
  }
  func.func @transform_2(%arg0: i32) -> (i32, i32, i32) {
    %c0_i32 = arith.constant 0 : i32
    %c0_i32_0 = arith.constant 0 : i32
    %c0_i32_1 = arith.constant 0 : i32
    return %arg0, %c0_i32, %c0_i32_0 : i32, i32, i32
  }
}

</mosaic_0001>

<bundles_post_ra>
// kernel: deconv_block_phased.1
= control target key start
LH: loop header
LB: loop body
LE: loop exit
PB: predicated region body
PF: predicated region fallthrough
CT: control target
= control target key end

     0   :  { %7 = vsyncpa [#allocation4], 0  ;;  %s997_s0 = inlined_call_operand.vmem [shape: bf16[16,37], index: 0, kind: input, shape index: {}]   ;;  %s998_s1 = inlined_call_operand.vmem [shape: bf16[2,4,512], index: 1, kind: input, shape index: {}]   ;;  %s999_s2 = inlined_call_operand.hbm [shape: f32[2,16,384], index: 2, kind: output, shape index: {}]  }
   0x1   :  { %9 = vsyncpa [#allocation4 + $0x1], 0  ;;  %s877_s9 = smov 0   ;;  %s879_s10 = smov 0  }
   0x2   :  { %s881_s11 = smov 0   ;;  %s883_s12 = smov 0  }
   0x3 LB: > { %s898_s13 = sadd.s32 4294967295, %s844_s12   ;;  %s673_s14 = sadd.s32 4294967294, %s844_s12   ;;  %s844_s12 = sphi %s883_s12, %s1005_s12   ;;  %s840_s11 = sphi %s881_s11, %s1004_s11   ;;  %s836_s10 = sphi %s879_s10, %s1003_s10   ;;  %s832_s9 = sphi %s877_s9, %s1002_s9  }
   0x4   : > { %s902_s15 = sadd.s32 1, %s844_s12   ;;  %s69_s16 = sadd.s32 1, %s840_s11 }
   0x5   : > { %s66_s17 = ssub.s32 %s844_s12, %s902_s15  ;;  %p79_p0 = scmp.ne.s32.totalorder %s840_s11, %s836_s10 }
   0x6   : > { %p67_p1 = scmp.eq.s32.totalorder %s66_s17, 0  ;;  %p80_p2 = scmp.eq.s32.totalorder %s898_s13, 1 }
   0x7   : > { %p85_p3 = scmp.ne.s32.totalorder %s836_s10, %s832_s9  ;;  %p86_p4 = scmp.eq.s32.totalorder %s673_s14, 1 }
   0x8   : > { %s913_s18 = scalar_select %p67_p1, %s840_s11, %s69_s16  }
   0x9   : > { %p915_p5 = por %p80_p2, %p79_p0  ;;  %p919_p6 = por %p86_p4, %p85_p3 }
   0xa   : > { %p676_p7 = scmp.ge.s32.totalorder %s844_s12, 1  ;;  %p115_p8 = scmp.lt.s32.totalorder %s844_s12, 3 }
   0xc   : > { %p116_p9 = pnand %p676_p7, %p115_p8 }
   0xd   : > { %p137_p10 = scmp.lt.s32.totalorder (!%p116_p9), %s898_s13, 1  ;;  %v171_v0 = vlaneseq (!%p116_p9)  ;;  %v846_v1 = vmov (!%p116_p9), 1983009808   ;;  %s847_s26 = smov (!%p116_p9), 126   ;;  %v850_v14 = vmov (!%p116_p9), 0.0   ;;  %vm414_vm0 = vcmask (!%p116_p9), 1042434  }
   0xe   : > { %119 = sbr.rel (%p116_p9) target bundleno = 423 (0x1a7), region = 28  ;;  %v169_v2 = vunpack.c.l.s4 (!%p116_p9), %v846_v1  ;;  %s848_s27 = smov (!%p116_p9), 127   ;;  %701 = vmatprep.subr.bf16.mxu1 (!%p116_p9), %v850_v14  ;;  %vm415_vm1 = vsmask.f32 (!%p116_p9), 2304  ;;  %vm417_vm2 = vcmask (!%p116_p9), 1046534   ;;  %vm856_vm7 = vmmov (!%p116_p9), 0  }
   0xf   : > { %v172_v3 = vshrl.u32 (!%p116_p9), %v171_v0, 7  ;;  %s849_s28 = smov (!%p116_p9), 110   ;;  %s851_s29 = smov (!%p116_p9), 109   ;;  %vm416_vm3 = vmand (!%p116_p9), %vm414_vm0, %vm415_vm1  ;;  %v424_v15 = vld [vmem:[#allocation2 + $0x38] sm:$0x4] (!%p116_p9)  ;;  %707 = vmatprep.mubr.msk.bf16.mxu1 (!%p116_p9), %vm856_vm7, %v850_v14  ;;  %v857_v19 = vmov (!%p116_p9), 0  }
  0x10   : > { %v170_v4 = vunpack.c.0.s8 (!%p116_p9), %v169_v2  ;;  %s852_s30 = smov (!%p116_p9), 108   ;;  %vm418_vm4 = vsmask.f32 (!%p116_p9), 6400  ;;  %v425_v16 = vsel (!%p116_p9), %vm416_vm3, 1065369472, %v424_v15  ;;  %s853_s3 = smov (!%p116_p9), 92   ;;  %533 = vmatprep.mubr.bf16.mxu0 (!%p116_p9), %v857_v19 }
  0x11   : > { %vm419_vm5 = vmand (!%p116_p9), %vm417_vm2, %vm418_vm4  ;;  %v421_v17 = vld [vmem:[#allocation2 + $0x30] sm:$0x44] (!%p116_p9)  ;;  %426 = vst [vmem:[#allocation2 + $0x38] sm:$0x4] (!%p116_p9), %v425_v16  ;;  %s854_s4 = smov (!%p116_p9), 91   ;;  %s855_s5 = smov (!%p116_p9), 90  }
  0x12   : > { %v173_v5 = vsub.s32 (!%p116_p9), %v170_v4, %v172_v3  ;;  %vm420_vm6 = vmor (!%p116_p9), %vm419_vm5, %vm416_vm3  ;;  %vm190_vm8 = vcmask (!%p116_p9), 1039360   ;;  %vm252_vm9 = vcmask (!%p116_p9), 900096   ;;  %vm188_vm10 = vcmask (!%p116_p9), 1043456   ;;  %s134_s8 = sand.u32 (!%p116_p9), 1, %s836_s10   ;;  %s712_s16 = smul.u32 (!%p116_p9), 768, %s898_s13 }
  0x13   : > { %v422_v18 = vsel (!%p116_p9), %vm420_vm6, 1065369472, %v421_v17  ;;  %vm221_vm11 = vcmask (!%p116_p9), 1031168   ;;  %vm283_vm12 = vcmask (!%p116_p9), 891904   ;;  %vm314_vm13 = vcmask (!%p116_p9), 883712   ;;  %s711_s14 = smul.u32 (!%p116_p9), 48, %s134_s8 }
  0x14   : > { %423 = vst [vmem:[#allocation2 + $0x30] sm:$0x44] (!%p116_p9), %v422_v18  ;;  %vm345_vm14 = vcmask (!%p116_p9), 752640   ;;  %vm376_vm15 = vcmask (!%p116_p9), 744448   ;;  %vm407_vm0 = vcmask (!%p116_p9), 736256   ;;  %vm488_vm1 = vcmask (!%p116_p9), 1041408   ;;  %s954_s23 = scalar_lea.hbm (!%p116_p9), %s999_s2, %s712_s16 }
  0x15   : > { %s138_s21 = scalar_select %p137_p10, %s898_s13, 1  ;;  %vm489_vm2 = vcmask 1042432   ;;  %v858_v17 = vmov 65535   ;;  %vm484_vm3 = vcmask 302080  }
  0x16   : > { %v490_v18 = vsel %vm488_vm1, 4294967295, %v858_v17  ;;  %s136_s17 = scalar_lea.vmem [#allocation3], %s711_s14  ;;  %s956_s24 = scalar_lea.sflag [#allocation4], %s134_s8 }
  0x17   : > { %s696_s22 = sshll.u32 %s138_s21, 3  ;;  %s611_s21 = sshll.u32 %s136_s17, 4  ;;  %s949_s21 = int_to_ptr.vmem [resolvable:$true] %s611_s21 }
  0x18   : > { %s141_s25 = scalar_lea.vmem %s998_s1, %s696_s22 }
  0x19   : > { %v197_v6 = vld [vmem:[%s141_s25] sm:$0xff] }
  0x1a   : > { %v144_v7 = vld [vmem:[%s141_s25] sm:$0x3f]  ;;  %v206_v8 = vrot.slane %v197_v6, %v173_v5  ;;  %v167_v9 = vcombine.low %v197_v6, %v197_v6  ;;  %v199_v11 = vcombine.high %v197_v6, %v197_v6  ;;  %s782_s25 = scalar_lea.vmem %s949_s21, 768 }
  0x1b   : > { %v146_v10 = vcombine.high %v144_v7, %v144_v7  ;;  %679 = vst.sshfl [vmem:[#allocation2] sm:$0xf pattern:$0x76325410] %v144_v7  ;;  %p783_p11 = scmp.ne.s32.totalorder %s949_s21, %s782_s25 }
  0x1c   : > { %214 = vrot.lane.b32.xlu1 %v206_v8, %s847_s26  ;;  %184 = vrot.lane.b32.xlu0 %v206_v8, %s848_s27  ;;  %v174_v12 = vrot.slane %v167_v9, %v173_v5  ;;  %v213_v13 = vrot.slane %v199_v11, %v173_v5 }
  0x1d   : > { %680 = vst.sshfl [vmem:[#allocation2 + $0x8] sm:$0x3 pattern:$0x76325410] %v146_v10  ;;  %p784_p12 = pnand %p783_p11, %p915_p5 }
  0x1f   : > { %p785_p13 = pneg %p784_p12 }
  0x20   : > { %247 = vrot.lane.b32.xlu1 %v206_v8, %s849_s28  ;;  %182 = vrot.lane.b32.xlu0 %v174_v12, %s848_s27 }
  0x24   : > { %216 = vrot.lane.b32.xlu1 %v213_v13, %s847_s26  ;;  %245 = vrot.lane.b32.xlu0 %v174_v12, %s849_s28  ;;  %s859_s26 = smov [#allocation3]  }
  0x25   : > { %s786_s27 = sshll.u32 %s859_s26, 4  ;;  %s787_s27 = int_to_ptr.vmem [resolvable:$false] %s786_s27 }
  0x26   : > { %s788_s28 = scalar_lea.vmem %s787_s27, 1536  ;;  %p789_p0 = scmp.lt.s32.totalorder %s949_s21, %s787_s27 }
  0x27   : > { %p790_p1 = scmp.lt.s32.totalorder %s788_s28, %s782_s25 }
  0x28   : > { %278 = vrot.lane.b32.xlu1 %v213_v13, %s851_s29  ;;  %276 = vrot.lane.b32.xlu0 %v206_v8, %s851_s29 }
  0x29   : > { %p791_p2 = por %p790_p1, %p789_p0 }
  0x2b   : > { %p792_p3 = pnand %p791_p2, %p785_p13 }
  0x2c   : > { %309 = vrot.lane.b32.xlu1 %v206_v8, %s852_s30  ;;  %307 = vrot.lane.b32.xlu0 %v174_v12, %s852_s30 }
  0x30   : > { %340 = vrot.lane.b32.xlu1 %v213_v13, %s853_s3  ;;  %338 = vrot.lane.b32.xlu0 %v206_v8, %s853_s3 }
  0x34   : > { %371 = vrot.lane.b32.xlu1 %v206_v8, %s854_s4  ;;  %369 = vrot.lane.b32.xlu0 %v174_v12, %s854_s4 }
  0x38   : > { %402 = vrot.lane.b32.xlu1 %v213_v13, %s855_s5  ;;  %400 = vrot.lane.b32.xlu0 %v206_v8, %s855_s5 }
  0x8e   : > { %v215_v20 = vpop.permute.xlu1 %214  ;;  %v185_v21 = vpop.permute.xlu0 %184 }
  0x8f   : > { %v187_v22 = vrot.slane %v185_v21, 4  ;;  %v218_v33 = vrot.slane %v215_v20, 4 }
  0x91   : > { %v192_v23 = vsel %vm190_vm8, %v185_v21, %v187_v22  ;;  %v491_v21 = vsel %vm489_vm2, %v490_v18, 0 }
  0x92   : > { %196 = vst [vmem:[#allocation2 + $0x8] sm:$0xc] %v192_v23  ;;  %v248_v24 = vpop.permute.xlu1 %247  ;;  %v183_v25 = vpop.permute.xlu0 %182 }
  0x93   : > { %v250_v26 = vrot.slane %v248_v24, 4  ;;  %v186_v27 = vrot.slane %v183_v25, 4 }
  0x95   : > { %v254_v28 = vsel %vm252_vm9, %v248_v24, %v250_v26  ;;  %v189_v29 = vsel %vm188_vm10, %v186_v27, %v187_v22  ;;  %v781_v27 = vld [vmem:[%s997_s0] sm:$0xff]  }
  0x96   : > { %258 = vst [vmem:[#allocation2 + $0x14] sm:$0xc] %v254_v28  ;;  %v191_v30 = vsel %vm190_vm8, %v183_v25, %v189_v29  ;;  %v217_v31 = vpop.permute.xlu1 %216  ;;  %v246_v32 = vpop.permute.xlu0 %245 }
  0x97   : > { %195 = vst [vmem:[#allocation2] sm:$0xcc] %v191_v30  ;;  %v219_v34 = vrot.slane %v217_v31, 4  ;;  %v249_v35 = vrot.slane %v246_v32, 4 }
  0x99   : > { %v220_v36 = vsel %vm188_vm10, %v218_v33, %v219_v34  ;;  %v223_v37 = vsel %vm221_vm11, %v217_v31, %v219_v34  ;;  %v251_v38 = vsel %vm188_vm10, %v249_v35, %v250_v26 }
  0x9a   : > { %v222_v39 = vsel %vm221_vm11, %v215_v20, %v220_v36  ;;  %227 = vst [vmem:[#allocation2 + $0x14] sm:$0x3] %v223_v37  ;;  %v253_v40 = vsel %vm252_vm9, %v246_v32, %v251_v38  ;;  %v279_v41 = vpop.permute.xlu1 %278  ;;  %v277_v42 = vpop.permute.xlu0 %276 }
  0x9b   : > { %226 = vst [vmem:[#allocation2 + $0xc] sm:$0x33] %v222_v39  ;;  %257 = vst [vmem:[#allocation2 + $0xc] sm:$0xcc] %v253_v40  ;;  %v281_v43 = vrot.slane %v279_v41, 4  ;;  %v280_v44 = vrot.slane %v277_v42, 4 }
  0x9d   : > { %v285_v45 = vsel %vm283_vm12, %v279_v41, %v281_v43  ;;  %v282_v46 = vsel %vm188_vm10, %v280_v44, %v281_v43 }
  0x9e   : > { %289 = vst [vmem:[#allocation2 + $0x20] sm:$0x3] %v285_v45  ;;  %v284_v47 = vsel %vm283_vm12, %v277_v42, %v282_v46  ;;  %v310_v48 = vpop.permute.xlu1 %309  ;;  %v308_v49 = vpop.permute.xlu0 %307 }
  0x9f   : > { %288 = vst [vmem:[#allocation2 + $0x18] sm:$0x33] %v284_v47  ;;  %v312_v50 = vrot.slane %v310_v48, 4  ;;  %v311_v51 = vrot.slane %v308_v49, 4 }
  0xa1   : > { %v316_v52 = vsel %vm314_vm13, %v310_v48, %v312_v50  ;;  %v313_v53 = vsel %vm188_vm10, %v311_v51, %v312_v50  ;;  %v770_v54 = vld [vmem:[#allocation2 + $0x8] ss:$12 sps:$4 sm:$0xff]  }
  0xa2   : > { %320 = vst [vmem:[#allocation2 + $0x20] sm:$0xc] %v316_v52  ;;  %v315_v55 = vsel %vm314_vm13, %v308_v49, %v313_v53  ;;  %v341_v56 = vpop.permute.xlu1 %340  ;;  %v339_v57 = vpop.permute.xlu0 %338  ;;  %v771_v58 = vld [vmem:[#allocation2 + $0x4] ss:$12 sps:$4 sm:$0xff]   ;;  %v773_v59 = vld [vmem:[#allocation2] ss:$12 sps:$4 sm:$0xff]   ;;  %702 = vmatpush3.bf16.msra.mxu1 %v770_v54 }
  0xa3   : > { %319 = vst [vmem:[#allocation2 + $0x18] sm:$0xcc] %v315_v55  ;;  %v343_v60 = vrot.slane %v341_v56, 4  ;;  %v342_v61 = vrot.slane %v339_v57, 4  ;;  %501 = vmatprep.subr.bf16.mxu0 %v771_v58  ;;  %703 = vmatprep.subr.bf16.mxu1 %v850_v14 }
  0xa4   : > { %502 = vmatpush1.bf16.msra.mxu0 %v773_v59 }
  0xa5   : > { %v347_v62 = vsel %vm345_vm14, %v341_v56, %v343_v60  ;;  %v344_v63 = vsel %vm188_vm10, %v342_v61, %v343_v60 }
  0xa6   : > { %351 = vst [vmem:[#allocation2 + $0x2c] sm:$0x3] %v347_v62  ;;  %v346_v0 = vsel %vm345_vm14, %v339_v57, %v344_v63  ;;  %v372_v1 = vpop.permute.xlu1 %371  ;;  %v370_v2 = vpop.permute.xlu0 %369 }
  0xa7   : > { %350 = vst [vmem:[#allocation2 + $0x24] sm:$0x33] %v346_v0  ;;  %v374_v3 = vrot.slane %v372_v1, 4  ;;  %v373_v4 = vrot.slane %v370_v2, 4 }
  0xa9   : > { %v378_v5 = vsel %vm376_vm15, %v372_v1, %v374_v3  ;;  %v375_v6 = vsel %vm188_vm10, %v373_v4, %v374_v3 }
  0xaa   : > { %382 = vst [vmem:[#allocation2 + $0x2c] sm:$0xc] %v378_v5  ;;  %v377_v7 = vsel %vm376_vm15, %v370_v2, %v375_v6  ;;  %v403_v8 = vpop.permute.xlu1 %402  ;;  %v401_v9 = vpop.permute.xlu0 %400 }
  0xab   : > { %381 = vst [vmem:[#allocation2 + $0x24] sm:$0xcc] %v377_v7  ;;  %v405_v10 = vrot.slane %v403_v8, 4  ;;  %v404_v11 = vrot.slane %v401_v9, 4 }
  0xad   : > { %v409_v12 = vsel %vm407_vm0, %v403_v8, %v405_v10  ;;  %v406_v13 = vsel %vm188_vm10, %v404_v11, %v405_v10 }
  0xae   : > { %413 = vst [vmem:[#allocation2 + $0x38] sm:$0x3] %v409_v12  ;;  %v408_v15 = vsel %vm407_vm0, %v401_v9, %v406_v13 }
  0xaf   : > { %412 = vst [vmem:[#allocation2 + $0x30] sm:$0x33] %v408_v15 }
  0xb1   : > { %v774_v16 = vld [vmem:[#allocation2 + $0x20] ss:$12 sps:$4 sm:$0xff]  }
  0xb2   : > { %v775_v19 = vld [vmem:[#allocation2 + $0x1c] ss:$12 sps:$4 sm:$0xff]   ;;  %v777_v20 = vld [vmem:[#allocation2 + $0x18] ss:$12 sps:$4 sm:$0xff]   ;;  %704 = vmatpush3.bf16.msra.mxu1 %v774_v16 }
  0xb3   : > { %503 = vmatprep.subr.bf16.mxu0 %v775_v19  ;;  %705 = vmatprep.subr.bf16.mxu1 %v850_v14 }
  0xb4   : > { %504 = vmatpush1.bf16.msra.mxu0 %v777_v20 }
  0xb5   : > { %v778_v22 = vld [vmem:[#allocation2 + $0x38] ss:$0 sps:$4 sm:$0x77]  }
  0xb6   : > { %v437_v23 = vld [vmem:[#allocation2 + $0x30] sm:$0x77]  ;;  %v499_v24 = vand.u32 %v778_v22, %v491_v21 }
  0xb7   : > { %v689_v25 = vcombine.high %v437_v23, %v437_v23  ;;  %v688_v26 = vcombine.low %v437_v23, %v437_v23 }
  0xb8   : > { %706 = vmatpush3.bf16.msra.mxu1 %v499_v24 }
  0xb9   : > { %v496_v28 = vand.u32 %v689_v25, %v491_v21  ;;  %v493_v29 = vand.u32 %v688_v26, %v491_v21 }
  0xbb   : > { %505 = vmatprep.subr.bf16.mxu0 %v496_v28  ;;  %708 = vmatmul.mubr.msk.bf16.vlgmr.msra.gmra.mrb[0].mxu1 %vm484_vm3, %v781_v27 }
  0xbc   : > { %506 = vmatpush1.bf16.msra.mxu0 %v493_v29 }
  0xbf   : > { %691 = vmatmul.mubr.msk.bf16.vlgmr.msra.gmra.mrb[0].mxu0 %vm484_vm3, %v781_v27 }
 0x18e   : > { %v578_v14 = vpop.f32.mrb[0].mxu1 }
 0x18f   : > { %v587_v30 = vmax.f32 %v578_v14, 0.0  ;;  %v709_v31 = vpop.f32.mrb[1].mxu1 }
 0x190   : > { %v581_v32 = vpop.f32.mrb[2].mxu1 }
 0x191   : > { %593 = vst [vmem:[%s136_s17 + $0x10] sm:$0xff] %v587_v30  ;;  %v590_v34 = vmax.f32 %v581_v32, 0.0  ;;  %v710_v35 = vpop.f32.mrb[3].mxu1 }
 0x192   : > { %v535_v33 = vpop.f32.mrb[0].mxu0 }
 0x193   : > { %v585_v36 = vmax.f32 %v535_v33, 0.0  ;;  %v537_v37 = vpop.f32.mrb[1].mxu0  ;;  %596 = vst [vmem:[%s136_s17 + $0x28] sm:$0xff] %v590_v34 }
 0x194   : > { %v586_v38 = vmax.f32 %v537_v37, 0.0  ;;  %v539_v39 = vpop.f32.mrb[2].mxu0 }
 0x195   : > { %591 = vst [vmem:[%s136_s17] sm:$0xff] %v585_v36  ;;  %v588_v40 = vmax.f32 %v539_v39, 0.0  ;;  %v541_v41 = vpop.f32.mrb[3].mxu0 }
 0x196   : > { %592 = vst [vmem:[%s136_s17 + $0x8] sm:$0xff] %v586_v38  ;;  %v589_v42 = vmax.f32 %v541_v41, 0.0 }
 0x197   : > { %594 = vst [vmem:[%s136_s17 + $0x18] sm:$0xff] %v588_v40 }
 0x198   : > { %595 = vst [vmem:[%s136_s17 + $0x20] sm:$0xff] %v589_v42 }
 0x199   : > { %795 = shalt.err (!%p792_p3)
}
 0x19a   : > { %s796_s29 = scalar_lea.hbm %s954_s23, 768  ;;  %s800_s4 = scalar_lea.hbm %s999_s2, 1536 }
 0x19b   : > { %p797_p4 = scmp.ne.s32.totalorder %s954_s23, %s796_s29  ;;  %p801_p9 = scmp.lt.u32.totalorder %s954_s23, %s999_s2 }
 0x19c   : > { %p802_p10 = scmp.lt.u32.totalorder %s800_s4, %s796_s29  ;;  %p804_p12 = scmp.lt.u32.totalorder %s796_s29, %s954_s23 }
 0x19d   : > { %p798_p7 = pnand %p797_p4, %p915_p5 }
 0x19e   : > { %p803_p11 = por %p802_p10, %p801_p9 }
 0x19f   : > { %p799_p8 = pneg %p798_p7 }
 0x1a0   : > { %p805_p13 = por %p804_p12, %p803_p11 }
 0x1a2   : > { %p806_p0 = pnand %p805_p13, %p799_p8 }
 0x1a4   : > { %809 = shalt.err (!%p806_p0)
}
 0x1a5   : > { %s860_s7 = smov 384   ;;  %s861_s8 = smov 24  }
 0x1a6   : > { %713 = dma.vmem_to_hbm [thread:$0]  (%p915_p5), %s949_s21, 768, %s954_s23, %s956_s24, %s860_s7, %s860_s7, %s861_s8  }
 0x1a7 PF: > { %p719_p1 = scmp.ge.s32.totalorder %s844_s12, 2  ;;  %s626_s14 = sand.u32 1, %s832_s9  }
 0x1a8   : > { %s627_s16 = scalar_lea.sflag [#allocation4], %s626_s14 }
 0x1a9   : > { %p716_p2 = pnand %p719_p1, %p919_p6 }
 0x1ab   : > { %827 = dma.done.wait (!%p716_p2), %s627_s16, 768  }
 0x1ac   : > { %829 = vsyncadd (!%p716_p2), %s627_s16, 4294966528  ;;  %p12_p3 = scmp.ge.s32.totalorder %s902_s15, 4   ;;  %s1002_s9 = smov %s836_s10 }
 0x1ad   : > { %s1003_s10 = smov %s840_s11  ;;  %s1004_s11 = smov %s913_s18 }
 0x1ae   : > { %s1005_s12 = smov %s902_s15  ;;  %14 = sbr.rel (!%p12_p3) target bundleno = 3 (0x3), region = 63 }
 0x1b5   :  { %632 = vsyncpa [#allocation4], 1 }
 0x1b6   :  { %634 = vsyncpa [#allocation4 + $0x1], 1 }

</bundles_post_ra>
